<compile_context>
chip_gen: v6e
topology: v6e:2x2x1
jax: 0.10.0
libtpu: 0.0.40
codegen_flags: <defaults>
</compile_context>

<pallas_src>
import jax
import jax.numpy as jnp
from jax.experimental import pallas as pl
from jax.experimental.pallas import tpu as pltpu

LANE = 128
MAX_BATCH_TILE = 4096  # comfortable VMEM budget even for huge replay batches


# ----------------------------------------------------------------------------
# Kernel
# ----------------------------------------------------------------------------
def dqn_kernel(x_ref,
               w1_ref, b1_ref,
               w2_ref, b2_ref,
               w3_ref, b3_ref,
               w4_ref, b4_ref,
               o_ref):
    """relu(relu(relu(relu(x@W1+b1)@W2+b2)@W3+b3)@W4+b4); bf16 MXU, f32 acc."""
    h = x_ref[...].astype(jnp.bfloat16)  # in-kernel cast: no extra XLA launch

    h = jnp.dot(h, w1_ref[...], preferred_element_type=jnp.float32) + b1_ref[...]
    h = jnp.maximum(h, 0.0).astype(jnp.bfloat16)

    h = jnp.dot(h, w2_ref[...], preferred_element_type=jnp.float32) + b2_ref[...]
    h = jnp.maximum(h, 0.0).astype(jnp.bfloat16)

    h = jnp.dot(h, w3_ref[...], preferred_element_type=jnp.float32) + b3_ref[...]
    h = jnp.maximum(h, 0.0).astype(jnp.bfloat16)

    h = jnp.dot(h, w4_ref[...], preferred_element_type=jnp.float32) + b4_ref[...]
    h = jnp.maximum(h, 0.0)  # ReLU after fc_4, exactly as in the PyTorch module

    o_ref[...] = h.astype(o_ref.dtype)


# ----------------------------------------------------------------------------
# One-time parameter preparation (hoisted out of the forward hot path)
# ----------------------------------------------------------------------------
def _round_up_lanes(n):
    return max(LANE, ((n + LANE - 1) // LANE) * LANE)


def prepare_dqn_params(params):
    """Cast weights to bf16 and zero-pad every layer's output width (and the
    matching next-layer input rows) to a multiple of 128 lanes. Run ONCE."""
    ws = [params[f"w{i}"] for i in range(1, 5)]
    bs = [params[f"b{i}"] for i in range(1, 5)]
    in_size = ws[0].shape[0]
    out_size = ws[-1].shape[1]

    ordered = []
    prev_pad = in_size  # the kernel input itself is not padded (K of layer 1)
    for w, b in zip(ws, bs):
        fan_in, fan_out = w.shape
        out_pad = _round_up_lanes(fan_out)
        wp = jnp.zeros((prev_pad, out_pad), jnp.bfloat16)
        wp = wp.at[:fan_in, :fan_out].set(w.astype(jnp.bfloat16))
        bp = jnp.zeros((1, out_pad), jnp.float32)
        bp = bp.at[:, :fan_out].set(b.astype(jnp.float32))
        ordered += [wp, bp]
        prev_pad = out_pad

    ordered = jax.block_until_ready(tuple(ordered))  # materialize once, up front
    return {
        "ordered": ordered,
        "in_size": in_size,
        "out_size": out_size,
        "out_pad": prev_pad,
    }


# ----------------------------------------------------------------------------
# Forward wrapper
# ----------------------------------------------------------------------------
def _default_batch_tile(B):
    try:
        kind = jax.devices()[0].device_kind.lower()
    except Exception:
        kind = ""
    # v7x: 2 TensorCores -> exactly 2 grid steps once there is enough work.
    # v5e/v6e: 1 TensorCore -> one big step (no per-step grid overhead).
    if "v7" in kind and B >= 512 and (B // 2) % 8 == 0:
        tile = B // 2
    else:
        tile = B
    # Keep very large replay batches inside a comfortable VMEM budget.
    while tile > MAX_BATCH_TILE and tile % 2 == 0 and (tile // 2) % 8 == 0:
        tile //= 2
    return tile


def _resident_spec(shape):
    """Whole-array block, constant index -> stays resident in VMEM.
    Buffered(1): constant index maps never re-fetch, so skip the 2nd buffer."""
    ndim = len(shape)
    index_map = lambda i: (0,) * ndim
    try:
        return pl.BlockSpec(shape, index_map, pipeline_mode=pl.Buffered(1))
    except (TypeError, AttributeError):
        return pl.BlockSpec(shape, index_map)


def dqn_forward(x, prepared, *, batch_tile=None, out_dtype=jnp.float32):
    """x: [B, input_size] f32. prepared: output of prepare_dqn_params."""
    B, in_size = x.shape
    assert in_size == prepared["in_size"]
    out_size = prepared["out_size"]
    out_pad = prepared["out_pad"]
    ordered = prepared["ordered"]

    if batch_tile is None:
        batch_tile = _default_batch_tile(B)
    assert B % batch_tile == 0, (B, batch_tile)
    grid = (B // batch_tile,)

    in_specs = [pl.BlockSpec((batch_tile, in_size), lambda i: (i, 0))]
    in_specs += [_resident_spec(a.shape) for a in ordered]
    out_spec = pl.BlockSpec((batch_tile, out_pad), lambda i: (i, 0))

    # Advisory cost estimate (this call is tiny / latency-bound).
    flops = 2 * B * sum(int(w.shape[0]) * int(w.shape[1]) for w in ordered[0::2])
    bytes_accessed = (x.size * x.dtype.itemsize
                      + sum(int(a.size) * a.dtype.itemsize for a in ordered)
                      + B * out_pad * jnp.dtype(out_dtype).itemsize)

    out = pl.pallas_call(
        dqn_kernel,
        out_shape=jax.ShapeDtypeStruct((B, out_pad), out_dtype),
        grid_spec=pltpu.PrefetchScalarGridSpec(
            num_scalar_prefetch=0,
            grid=grid,
            in_specs=in_specs,
            out_specs=out_spec,
        ),
        compiler_params=pltpu.CompilerParams(
            dimension_semantics=("parallel",)),
        cost_estimate=pl.CostEstimate(
            flops=flops, transcendentals=0, bytes_accessed=bytes_accessed),
    )(x, *ordered)

    return out[:, :out_size]


# ----------------------------------------------------------------------------
# Init (mirrors the PyTorch module) + references
# ----------------------------------------------------------------------------
def init_dqn_params(key, input_size, n_hidden1, n_hidden2, n_hidden3, output_size):
    """PyTorch module: weights ~ N(0, 0.1); biases keep nn.Linear's default
    U(-1/sqrt(fan_in), +1/sqrt(fan_in)). Stored as [in, out] (= W_torch.T)."""
    dims = [(input_size, n_hidden1),
            (n_hidden1, n_hidden2),
            (n_hidden2, n_hidden3),
            (n_hidden3, output_size)]
    params = {}
    for idx, (fan_in, fan_out) in enumerate(dims, start=1):
        key, kw, kb = jax.random.split(key, 3)
        w = 0.1 * jax.random.normal(kw, (fan_in, fan_out), dtype=jnp.float32)
        bound = 1.0 / jnp.sqrt(jnp.float32(fan_in))
        b = jax.random.uniform(kb, (1, fan_out), dtype=jnp.float32,
                               minval=-bound, maxval=bound)
        params[f"w{idx}"] = w
        params[f"b{idx}"] = b
    return params


def dqn_reference_bf16(x, params):
    """Same math as the kernel (bf16 matmuls, f32 acc) for a tight comparison."""
    h = x.astype(jnp.bfloat16)
    for i in range(1, 5):
        w = params[f"w{i}"].astype(jnp.bfloat16)
        acc = jnp.dot(h, w, preferred_element_type=jnp.float32) + params[f"b{i}"]
        acc = jnp.maximum(acc, 0.0)
        h = acc.astype(jnp.bfloat16) if i < 4 else acc
    return h


def dqn_reference_f32(x, params):
    h = x
    for i in range(1, 5):
        h = jnp.maximum(h @ params[f"w{i}"] + params[f"b{i}"], 0.0)
    return h


# ----------------------------------------------------------------------------
# Self-test
# ----------------------------------------------------------------------------
if __name__ == "__main__":
    key = jax.random.PRNGKey(0)

    # Small shapes consistent with the 4-layer MLP structure of the module.
    B = 256
    input_size, n_hidden1, n_hidden2, n_hidden3, output_size = 32, 64, 64, 32, 16

    key, kx = jax.random.split(key)
    x = jax.random.normal(kx, (B, input_size), dtype=jnp.float32)

    params = init_dqn_params(key, input_size, n_hidden1, n_hidden2,
                             n_hidden3, output_size)
    prepared = prepare_dqn_params(params)   # hoisted weight prep (runs once)

    out = dqn_forward(x, prepared)          # default: 1 grid step (2 on v7x @ B>=512)
    out = jax.block_until_ready(out)
    assert out.shape == (B, output_size)

    # Tight check against a reference doing the same bf16/f32-acc math.
    ref_bf = dqn_reference_bf16(x, params)
    assert jnp.allclose(out, ref_bf, atol=1e-2, rtol=1e-2), \
        float(jnp.max(jnp.abs(out - ref_bf)))

    # Loose check against the pure-f32 reference (bf16 quantization error only).
    ref_f32 = dqn_reference_f32(x, params)
    scale = float(jnp.max(jnp.abs(ref_f32))) + 1e-6
    assert float(jnp.max(jnp.abs(out - ref_f32))) < 5e-2 * scale

    print("KERNEL_OK")
</pallas_src>

<mosaic_0001>
module attributes {stable_mosaic.version = 11 : i64} {
  func.func @dqn_kernel(%arg0: i32, %arg1: memref<256x32xf32, #tpu.memory_space<vmem>>, %arg2: memref<32x128xbf16, #tpu.memory_space<vmem>>, %arg3: memref<1x128xf32, #tpu.memory_space<vmem>>, %arg4: memref<128x128xbf16, #tpu.memory_space<vmem>>, %arg5: memref<1x128xf32, #tpu.memory_space<vmem>>, %arg6: memref<128x128xbf16, #tpu.memory_space<vmem>>, %arg7: memref<1x128xf32, #tpu.memory_space<vmem>>, %arg8: memref<128x128xbf16, #tpu.memory_space<vmem>>, %arg9: memref<1x128xf32, #tpu.memory_space<vmem>>, %arg10: memref<256x128xf32, #tpu.memory_space<vmem>>) attributes {dimension_semantics = [#tpu.dimension_semantics<parallel>], iteration_bounds = array<i64: 1>, scalar_prefetch = 0 : i64, scratch_operands = 0 : i64, tpu.core_type = #tpu.core_type<tc>, window_params = [{transform_indices = @transform_0, window_bounds = array<i64: 256, 32>}, {pipeline_mode = #tpu.pipeline_mode<synchronous>, transform_indices = @transform_1, window_bounds = array<i64: 32, 128>}, {pipeline_mode = #tpu.pipeline_mode<synchronous>, transform_indices = @transform_2, window_bounds = array<i64: 1, 128>}, {pipeline_mode = #tpu.pipeline_mode<synchronous>, transform_indices = @transform_3, window_bounds = array<i64: 128, 128>}, {pipeline_mode = #tpu.pipeline_mode<synchronous>, transform_indices = @transform_4, window_bounds = array<i64: 1, 128>}, {pipeline_mode = #tpu.pipeline_mode<synchronous>, transform_indices = @transform_5, window_bounds = array<i64: 128, 128>}, {pipeline_mode = #tpu.pipeline_mode<synchronous>, transform_indices = @transform_6, window_bounds = array<i64: 1, 128>}, {pipeline_mode = #tpu.pipeline_mode<synchronous>, transform_indices = @transform_7, window_bounds = array<i64: 128, 128>}, {pipeline_mode = #tpu.pipeline_mode<synchronous>, transform_indices = @transform_8, window_bounds = array<i64: 1, 128>}, {transform_indices = @transform_9, window_bounds = array<i64: 256, 128>}]} {
    %c0 = arith.constant 0 : index
    %c0_0 = arith.constant 0 : index
    %0 = vector.load %arg1[%c0, %c0_0] : memref<256x32xf32, #tpu.memory_space<vmem>>, vector<256x32xf32>
    %1 = arith.truncf %0 : vector<256x32xf32> to vector<256x32xbf16>
    %c0_1 = arith.constant 0 : index
    %c0_2 = arith.constant 0 : index
    %2 = vector.load %arg2[%c0_1, %c0_2] : memref<32x128xbf16, #tpu.memory_space<vmem>>, vector<32x128xbf16>
    %cst = arith.constant dense<0.000000e+00> : vector<256x128xf32>
    %3 = tpu.matmul %1, %2, %cst {dimension_numbers = #tpu.dot_dimension_numbers<[1], [0], [0], [1], [0, 0, 1, 1], [], []>} : vector<256x32xbf16>, vector<32x128xbf16>, vector<256x128xf32> -> vector<256x128xf32>
    %c0_3 = arith.constant 0 : index
    %c0_4 = arith.constant 0 : index
    %4 = vector.load %arg3[%c0_3, %c0_4] : memref<1x128xf32, #tpu.memory_space<vmem>>, vector<1x128xf32>
    %5 = vector.broadcast %4 : vector<1x128xf32> to vector<256x128xf32>
    %6 = arith.addf %3, %5 : vector<256x128xf32>
    %cst_5 = arith.constant 0.000000e+00 : f32
    %7 = vector.broadcast %cst_5 : f32 to vector<256x128xf32>
    %8 = arith.maximumf %6, %7 : vector<256x128xf32>
    %9 = arith.truncf %8 : vector<256x128xf32> to vector<256x128xbf16>
    %c0_6 = arith.constant 0 : index
    %c0_7 = arith.constant 0 : index
    %10 = vector.load %arg4[%c0_6, %c0_7] : memref<128x128xbf16, #tpu.memory_space<vmem>>, vector<128x128xbf16>
    %cst_8 = arith.constant dense<0.000000e+00> : vector<256x128xf32>
    %11 = tpu.matmul %9, %10, %cst_8 {dimension_numbers = #tpu.dot_dimension_numbers<[1], [0], [0], [1], [0, 0, 1, 1], [], []>} : vector<256x128xbf16>, vector<128x128xbf16>, vector<256x128xf32> -> vector<256x128xf32>
    %c0_9 = arith.constant 0 : index
    %c0_10 = arith.constant 0 : index
    %12 = vector.load %arg5[%c0_9, %c0_10] : memref<1x128xf32, #tpu.memory_space<vmem>>, vector<1x128xf32>
    %13 = vector.broadcast %12 : vector<1x128xf32> to vector<256x128xf32>
    %14 = arith.addf %11, %13 : vector<256x128xf32>
    %cst_11 = arith.constant 0.000000e+00 : f32
    %15 = vector.broadcast %cst_11 : f32 to vector<256x128xf32>
    %16 = arith.maximumf %14, %15 : vector<256x128xf32>
    %17 = arith.truncf %16 : vector<256x128xf32> to vector<256x128xbf16>
    %c0_12 = arith.constant 0 : index
    %c0_13 = arith.constant 0 : index
    %18 = vector.load %arg6[%c0_12, %c0_13] : memref<128x128xbf16, #tpu.memory_space<vmem>>, vector<128x128xbf16>
    %cst_14 = arith.constant dense<0.000000e+00> : vector<256x128xf32>
    %19 = tpu.matmul %17, %18, %cst_14 {dimension_numbers = #tpu.dot_dimension_numbers<[1], [0], [0], [1], [0, 0, 1, 1], [], []>} : vector<256x128xbf16>, vector<128x128xbf16>, vector<256x128xf32> -> vector<256x128xf32>
    %c0_15 = arith.constant 0 : index
    %c0_16 = arith.constant 0 : index
    %20 = vector.load %arg7[%c0_15, %c0_16] : memref<1x128xf32, #tpu.memory_space<vmem>>, vector<1x128xf32>
    %21 = vector.broadcast %20 : vector<1x128xf32> to vector<256x128xf32>
    %22 = arith.addf %19, %21 : vector<256x128xf32>
    %cst_17 = arith.constant 0.000000e+00 : f32
    %23 = vector.broadcast %cst_17 : f32 to vector<256x128xf32>
    %24 = arith.maximumf %22, %23 : vector<256x128xf32>
    %25 = arith.truncf %24 : vector<256x128xf32> to vector<256x128xbf16>
    %c0_18 = arith.constant 0 : index
    %c0_19 = arith.constant 0 : index
    %26 = vector.load %arg8[%c0_18, %c0_19] : memref<128x128xbf16, #tpu.memory_space<vmem>>, vector<128x128xbf16>
    %cst_20 = arith.constant dense<0.000000e+00> : vector<256x128xf32>
    %27 = tpu.matmul %25, %26, %cst_20 {dimension_numbers = #tpu.dot_dimension_numbers<[1], [0], [0], [1], [0, 0, 1, 1], [], []>} : vector<256x128xbf16>, vector<128x128xbf16>, vector<256x128xf32> -> vector<256x128xf32>
    %c0_21 = arith.constant 0 : index
    %c0_22 = arith.constant 0 : index
    %28 = vector.load %arg9[%c0_21, %c0_22] : memref<1x128xf32, #tpu.memory_space<vmem>>, vector<1x128xf32>
    %29 = vector.broadcast %28 : vector<1x128xf32> to vector<256x128xf32>
    %30 = arith.addf %27, %29 : vector<256x128xf32>
    %cst_23 = arith.constant 0.000000e+00 : f32
    %31 = vector.broadcast %cst_23 : f32 to vector<256x128xf32>
    %32 = arith.maximumf %30, %31 : vector<256x128xf32>
    %c0_24 = arith.constant 0 : index
    %c0_25 = arith.constant 0 : index
    %33 = vector.load %arg10[%c0_24, %c0_25] : memref<256x128xf32, #tpu.memory_space<vmem>>, vector<256x128xf32>
    tpu.vector_store %arg10[%c0_24, %c0_25], %32 {strides = array<i32>} : memref<256x128xf32, #tpu.memory_space<vmem>>, vector<256x128xf32>,
    return
  }
  func.func @transform_0(%arg0: i32) -> (i32, i32) {
    %c0_i32 = arith.constant 0 : i32
    %c0_i32_0 = arith.constant 0 : i32
    return %arg0, %c0_i32 : i32, i32
  }
  func.func @transform_1(%arg0: i32) -> (i32, i32) {
    %c0_i32 = arith.constant 0 : i32
    %c0_i32_0 = arith.constant 0 : i32
    %c0_i32_1 = arith.constant 0 : i32
    return %c0_i32, %c0_i32_0 : i32, i32
  }
  func.func @transform_2(%arg0: i32) -> (i32, i32) {
    %c0_i32 = arith.constant 0 : i32
    %c0_i32_0 = arith.constant 0 : i32
    %c0_i32_1 = arith.constant 0 : i32
    return %c0_i32, %c0_i32_0 : i32, i32
  }
  func.func @transform_3(%arg0: i32) -> (i32, i32) {
    %c0_i32 = arith.constant 0 : i32
    %c0_i32_0 = arith.constant 0 : i32
    %c0_i32_1 = arith.constant 0 : i32
    return %c0_i32, %c0_i32_0 : i32, i32
  }
  func.func @transform_4(%arg0: i32) -> (i32, i32) {
    %c0_i32 = arith.constant 0 : i32
    %c0_i32_0 = arith.constant 0 : i32
    %c0_i32_1 = arith.constant 0 : i32
    return %c0_i32, %c0_i32_0 : i32, i32
  }
  func.func @transform_5(%arg0: i32) -> (i32, i32) {
    %c0_i32 = arith.constant 0 : i32
    %c0_i32_0 = arith.constant 0 : i32
    %c0_i32_1 = arith.constant 0 : i32
    return %c0_i32, %c0_i32_0 : i32, i32
  }
  func.func @transform_6(%arg0: i32) -> (i32, i32) {
    %c0_i32 = arith.constant 0 : i32
    %c0_i32_0 = arith.constant 0 : i32
    %c0_i32_1 = arith.constant 0 : i32
    return %c0_i32, %c0_i32_0 : i32, i32
  }
  func.func @transform_7(%arg0: i32) -> (i32, i32) {
    %c0_i32 = arith.constant 0 : i32
    %c0_i32_0 = arith.constant 0 : i32
    %c0_i32_1 = arith.constant 0 : i32
    return %c0_i32, %c0_i32_0 : i32, i32
  }
  func.func @transform_8(%arg0: i32) -> (i32, i32) {
    %c0_i32 = arith.constant 0 : i32
    %c0_i32_0 = arith.constant 0 : i32
    %c0_i32_1 = arith.constant 0 : i32
    return %c0_i32, %c0_i32_0 : i32, i32
  }
  func.func @transform_9(%arg0: i32) -> (i32, i32) {
    %c0_i32 = arith.constant 0 : i32
    %c0_i32_0 = arith.constant 0 : i32
    return %arg0, %c0_i32 : i32, i32
  }
}

</mosaic_0001>

<bundles_post_ra>
// kernel: tpu_custom_call.1
= control target key start
LH: loop header
LB: loop body
LE: loop exit
PB: predicated region body
PF: predicated region fallthrough
CT: control target
= control target key end

     0   :  { %vm105_vm0 = vcmask 261120   ;;  %s2030_s0 = inlined_call_operand.vmem [shape: f32[256,32], index: 0, kind: input, shape index: {}]   ;;  %s2031_s1 = inlined_call_operand.vmem [shape: bf16[32,128], index: 1, kind: input, shape index: {}]   ;;  %s2032_s2 = inlined_call_operand.vmem [shape: f32[1,128], index: 2, kind: input, shape index: {}]   ;;  %s2033_s3 = inlined_call_operand.vmem [shape: bf16[128,128], index: 3, kind: input, shape index: {}]   ;;  %s2034_s4 = inlined_call_operand.vmem [shape: f32[1,128], index: 4, kind: input, shape index: {}]   ;;  %s2035_s5 = inlined_call_operand.vmem [shape: bf16[128,128], index: 5, kind: input, shape index: {}]   ;;  %s2036_s6 = inlined_call_operand.vmem [shape: f32[1,128], index: 6, kind: input, shape index: {}]   ;;  %s2037_s7 = inlined_call_operand.vmem [shape: bf16[128,128], index: 7, kind: input, shape index: {}]   ;;  %s2038_s8 = inlined_call_operand.vmem [shape: f32[1,128], index: 8, kind: input, shape index: {}]   ;;  %s2039_s9 = inlined_call_operand.hbm [shape: f32[256,128], index: 9, kind: output, shape index: {}]  }
   0x1   :  { %v1570_v0 = vld [vmem:[%s2031_s1 + $0x8] sm:$0xff]   ;;  %v1571_v1 = vld [vmem:[%s2031_s1] sm:$0xff]   ;;  %v36_v5 = vld [vmem:[%s2030_s0 + $0x10] sm:$0xff] }
   0x2   :  { %1371 = vmatprep.subr.bf16.mxu0 %v1570_v0  ;;  %v34_v2 = vld [vmem:[%s2030_s0] sm:$0xff]  ;;  %v35_v3 = vld [vmem:[%s2030_s0 + $0x8] sm:$0xff]  ;;  %v37_v6 = vld [vmem:[%s2030_s0 + $0x18] sm:$0xff] }
   0x3   :  { %1372 = vmatpush3.bf16.msra.mxu0 %v1570_v0  ;;  %v66_v4 = vpack.c.bf16 %v35_v3, %v34_v2  ;;  %v38_v7 = vld [vmem:[%s2030_s0 + $0x20] sm:$0xff]  ;;  %v39_v8 = vld [vmem:[%s2030_s0 + $0x28] sm:$0xff]  ;;  %v67_v9 = vpack.c.bf16 %v37_v6, %v36_v5  ;;  %v40_v11 = vld [vmem:[%s2030_s0 + $0x30] sm:$0xff] }
   0x4   :  { %1373 = vmatprep.subr.bf16.mxu0 %v1571_v1  ;;  %v68_v10 = vpack.c.bf16 %v39_v8, %v38_v7  ;;  %v41_v12 = vld [vmem:[%s2030_s0 + $0x38] sm:$0xff]  ;;  %v42_v13 = vld [vmem:[%s2030_s0 + $0x40] sm:$0xff]  ;;  %v43_v14 = vld [vmem:[%s2030_s0 + $0x48] sm:$0xff] }
   0x5   :  { %1375 = vmatprep.mubr.msk.bf16.mxu0 %vm105_vm0, %v66_v4  ;;  %v1572_v15 = vld [vmem:[%s2033_s3 + $0x38] sm:$0xff]   ;;  %v69_v16 = vpack.c.bf16 %v41_v12, %v40_v11  ;;  %v1573_v17 = vld [vmem:[%s2033_s3 + $0x30] sm:$0xff]   ;;  %v70_v18 = vpack.c.bf16 %v43_v14, %v42_v13  ;;  %v1574_v21 = vld [vmem:[%s2033_s3 + $0x28] sm:$0xff]  }
   0x6   :  { %1407 = vmatprep.subr.bf16.mxu1 %v1572_v15  ;;  %v44_v19 = vld [vmem:[%s2030_s0 + $0x50] sm:$0xff]  ;;  %v45_v20 = vld [vmem:[%s2030_s0 + $0x58] sm:$0xff]  ;;  %v46_v22 = vld [vmem:[%s2030_s0 + $0x60] sm:$0xff] }
   0x7   :  { %1374 = vmatpush3.bf16.msra.mxu0 %v1571_v1  ;;  %1408 = vmatpush3.bf16.msra.mxu1 %v1572_v15  ;;  %v47_v23 = vld [vmem:[%s2030_s0 + $0x68] sm:$0xff]  ;;  %v1575_v24 = vld [vmem:[%s2033_s3 + $0x20] sm:$0xff]   ;;  %v71_v25 = vpack.c.bf16 %v45_v20, %v44_v19  ;;  %v1576_v27 = vld [vmem:[%s2033_s3 + $0x18] sm:$0xff]  }
   0x8   :  { %1409 = vmatprep.subr.bf16.mxu1 %v1573_v17  ;;  %v72_v26 = vpack.c.bf16 %v47_v23, %v46_v22  ;;  %v48_v28 = vld [vmem:[%s2030_s0 + $0x70] sm:$0xff]  ;;  %v49_v29 = vld [vmem:[%s2030_s0 + $0x78] sm:$0xff]  ;;  %v50_v30 = vld [vmem:[%s2030_s0 + $0x80] sm:$0xff] }
   0x9   :  { %v51_v31 = vld [vmem:[%s2030_s0 + $0x88] sm:$0xff]  ;;  %v73_v32 = vpack.c.bf16 %v49_v29, %v48_v28 }
   0xa   :  { %1376 = vmatmul.mubr.msk.bf16.vlgmr.msra.gmra.mxu0 %vm105_vm0, %v67_v9 }
   0xb   :  { %1379 = vmatprep.mubr.msk.bf16.mxu0 %vm105_vm0, %v68_v10  ;;  %1410 = vmatpush3.bf16.msra.mxu1 %v1573_v17 }
   0xc   :  { %1411 = vmatprep.subr.bf16.mxu1 %v1574_v21 }
   0xf   :  { %1412 = vmatpush3.bf16.msra.mxu1 %v1574_v21 }
  0x10   :  { %1413 = vmatprep.subr.bf16.mxu1 %v1575_v24 }
  0x12   :  { %1380 = vmatmul.mubr.msk.bf16.gmra.mxu0 %vm105_vm0, %v69_v16 }
  0x13   :  { %1383 = vmatprep.mubr.msk.bf16.mxu0 %vm105_vm0, %v70_v18  ;;  %1414 = vmatpush3.bf16.msra.mxu1 %v1575_v24 }
  0x14   :  { %1415 = vmatprep.subr.bf16.mxu1 %v1576_v27 }
  0x1a   :  { %1384 = vmatmul.mubr.msk.bf16.gmra.mxu0 %vm105_vm0, %v71_v25 }
  0x1b   :  { %1387 = vmatprep.mubr.msk.bf16.mxu0 %vm105_vm0, %v72_v26 }
  0x1c   :  { %14 = vsyncpa [#allocation3], 0  ;;  %v74_v33 = vpack.c.bf16 %v51_v31, %v50_v30  ;;  %1416 = vmatpush3.bf16.msra.mxu1 %v1576_v27  ;;  %v52_v34 = vld [vmem:[%s2030_s0 + $0x90] sm:$0xff]  ;;  %v53_v35 = vld [vmem:[%s2030_s0 + $0x98] sm:$0xff] }
  0x1d   :  { %v54_v36 = vld [vmem:[%s2030_s0 + $0xa0] sm:$0xff]  ;;  %v55_v37 = vld [vmem:[%s2030_s0 + $0xa8] sm:$0xff]  ;;  %v75_v38 = vpack.c.bf16 %v53_v35, %v52_v34  ;;  %v56_v40 = vld [vmem:[%s2030_s0 + $0xb0] sm:$0xff] }
  0x1e   :  { %v76_v39 = vpack.c.bf16 %v55_v37, %v54_v36  ;;  %v57_v41 = vld [vmem:[%s2030_s0 + $0xb8] sm:$0xff]  ;;  %v58_v42 = vld [vmem:[%s2030_s0 + $0xc0] sm:$0xff]  ;;  %v59_v43 = vld [vmem:[%s2030_s0 + $0xc8] sm:$0xff] }
  0x1f   :  { %v77_v44 = vpack.c.bf16 %v57_v41, %v56_v40  ;;  %v78_v45 = vpack.c.bf16 %v59_v43, %v58_v42  ;;  %v60_v46 = vld [vmem:[%s2030_s0 + $0xd0] sm:$0xff]  ;;  %v61_v47 = vld [vmem:[%s2030_s0 + $0xd8] sm:$0xff]  ;;  %v62_v48 = vld [vmem:[%s2030_s0 + $0xe0] sm:$0xff] }
  0x20   :  { %v63_v49 = vld [vmem:[%s2030_s0 + $0xe8] sm:$0xff]  ;;  %v79_v50 = vpack.c.bf16 %v61_v47, %v60_v46  ;;  %v64_v52 = vld [vmem:[%s2030_s0 + $0xf0] sm:$0xff]  ;;  %v65_v53 = vld [vmem:[%s2030_s0 + $0xf8] sm:$0xff] }
  0x21   :  { %v80_v51 = vpack.c.bf16 %v63_v49, %v62_v48  ;;  %v81_v54 = vpack.c.bf16 %v65_v53, %v64_v52  ;;  %v1577_v55 = vld [vmem:[%s2033_s3 + $0x10] sm:$0xff]   ;;  %v1578_v56 = vld [vmem:[%s2033_s3 + $0x8] sm:$0xff]   ;;  %v1579_v57 = vld [vmem:[%s2033_s3] sm:$0xff]  }
  0x22   :  { %1388 = vmatmul.mubr.msk.bf16.gmra.mxu0 %vm105_vm0, %v73_v32  ;;  %1417 = vmatprep.subr.bf16.mxu1 %v1577_v55  ;;  %v1580_v58 = vld [vmem:[%s2035_s5 + $0x38] sm:$0xff]   ;;  %v1581_v59 = vld [vmem:[%s2035_s5 + $0x30] sm:$0xff]   ;;  %v1582_v60 = vld [vmem:[%s2035_s5 + $0x28] sm:$0xff]  }
  0x23   :  { %1391 = vmatprep.mubr.msk.bf16.mxu0 %vm105_vm0, %v74_v33  ;;  %1418 = vmatpush3.bf16.msra.mxu1 %v1577_v55  ;;  %v1583_v61 = vld [vmem:[%s2035_s5 + $0x20] sm:$0xff]   ;;  %v1584_v62 = vld [vmem:[%s2035_s5 + $0x18] sm:$0xff]   ;;  %v1585_v63 = vld [vmem:[%s2035_s5 + $0x10] sm:$0xff]  }
  0x24   :  { %1419 = vmatprep.subr.bf16.mxu1 %v1578_v56  ;;  %1455 = vmatprep.subr.bf16.mxu0 %v1580_v58  ;;  %v1586_v0 = vld [vmem:[%s2035_s5 + $0x8] sm:$0xff]   ;;  %v1837_v3 = vld [vmem:[%s2032_s2] ss:$0 sm:$0xff] }
  0x25   :  { %1456 = vmatpush3.bf16.msra.mxu0 %v1580_v58 }
  0x26   :  { %1457 = vmatprep.subr.bf16.mxu0 %v1581_v59 }
  0x27   :  { %1420 = vmatpush3.bf16.msra.mxu1 %v1578_v56 }
  0x28   :  { %1421 = vmatprep.subr.bf16.mxu1 %v1579_v57 }
  0x29   :  { %1458 = vmatpush3.bf16.msra.mxu0 %v1581_v59 }
  0x2a   :  { %1392 = vmatmul.mubr.msk.bf16.gmra.mxu0 %vm105_vm0, %v75_v38  ;;  %1459 = vmatprep.subr.bf16.mxu0 %v1582_v60 }
  0x2b   :  { %1395 = vmatprep.mubr.msk.bf16.mxu0 %vm105_vm0, %v76_v39  ;;  %1422 = vmatpush3.bf16.msra.mxu1 %v1579_v57 }
  0x2d   :  { %1460 = vmatpush3.bf16.msra.mxu0 %v1582_v60 }
  0x2e   :  { %1461 = vmatprep.subr.bf16.mxu0 %v1583_v61 }
  0x31   :  { %1462 = vmatpush3.bf16.msra.mxu0 %v1583_v61 }
  0x32   :  { %1396 = vmatmul.mubr.msk.bf16.gmra.mxu0 %vm105_vm0, %v77_v44  ;;  %1463 = vmatprep.subr.bf16.mxu0 %v1584_v62 }
  0x33   :  { %1399 = vmatprep.mubr.msk.bf16.mxu0 %vm105_vm0, %v78_v45 }
  0x35   :  { %1464 = vmatpush3.bf16.msra.mxu0 %v1584_v62 }
  0x36   :  { %1465 = vmatprep.subr.bf16.mxu0 %v1585_v63 }
  0x39   :  { %1466 = vmatpush3.bf16.msra.mxu0 %v1585_v63 }
  0x3a   :  { %1400 = vmatmul.mubr.msk.bf16.gmra.mxu0 %vm105_vm0, %v79_v50  ;;  %1467 = vmatprep.subr.bf16.mxu0 %v1586_v0 }
  0x3b   :  { %1403 = vmatprep.mubr.msk.bf16.mxu0 %vm105_vm0, %v80_v51 }
  0x3d   :  { %1468 = vmatpush3.bf16.msra.mxu0 %v1586_v0 }
  0x42   :  { %1404 = vmatmul.mubr.msk.bf16.gmra.mxu0 %vm105_vm0, %v81_v54 }
  0xca   :  { %v1377_v1 = vpop.f32.mrf.mxu0 }
  0xcb   :  { %v197_v7 = vadd.f32 %v1377_v1, %v1837_v3 }
  0xcc   :  { %v188_v2 = vpop.f32.mrf.mxu0 }
  0xcd   :  { %v189_v5 = vadd.f32 %v1837_v3, %v188_v2  ;;  %v317_v14 = vmax.f32 %v197_v7, 0.0 }
  0xce   :  { %v1378_v4 = vpop.f32.mrf.mxu0 }
  0xcf   :  { %v200_v6 = vadd.f32 %v1378_v4, %v1837_v3  ;;  %v315_v12 = vmax.f32 %v189_v5, 0.0 }
  0xd0   :  { %v191_v8 = vpop.f32.mrf.mxu0 }
  0xd1   :  { %v192_v9 = vadd.f32 %v1837_v3, %v191_v8  ;;  %v318_v10 = vmax.f32 %v200_v6, 0.0 }
  0xd2   :  { %v1381_v11 = vpop.f32.mrf.mxu0 }
  0xd3   :  { %v316_v13 = vmax.f32 %v192_v9, 0.0  ;;  %v348_v17 = vpack.c.bf16 %v318_v10, %v317_v14  ;;  %v213_v21 = vadd.f32 %v1381_v11, %v1837_v3 }
  0xd4   :  { %v204_v15 = vpop.f32.mrf.mxu0 }
  0xd5   :  { %v347_v16 = vpack.c.bf16 %v316_v13, %v315_v12  ;;  %v205_v19 = vadd.f32 %v1837_v3, %v204_v15  ;;  %v321_v28 = vmax.f32 %v213_v21, 0.0 }
  0xd6   :  { %v1382_v18 = vpop.f32.mrf.mxu0 }
  0xd7   :  { %v216_v20 = vadd.f32 %v1382_v18, %v1837_v3  ;;  %1423 = vmatprep.mubr.bf16.mxu1 %v347_v16  ;;  %v319_v26 = vmax.f32 %v205_v19, 0.0 }
  0xd8   :  { %v207_v22 = vpop.f32.mrf.mxu0  ;;  %1424 = vmatmul.mubr.bf16.vlgmr.msra.gmra.mxu1 %v348_v17 }
  0xd9   :  { %v208_v23 = vadd.f32 %v1837_v3, %v207_v22  ;;  %v322_v24 = vmax.f32 %v216_v20, 0.0 }
  0xda   :  { %v1385_v25 = vpop.f32.mrf.mxu0 }
  0xdb   :  { %v320_v27 = vmax.f32 %v208_v23, 0.0  ;;  %v350_v31 = vpack.c.bf16 %v322_v24, %v321_v28  ;;  %v229_v35 = vadd.f32 %v1385_v25, %v1837_v3 }
  0xdc   :  { %v220_v29 = vpop.f32.mrf.mxu0 }
  0xdd   :  { %v349_v30 = vpack.c.bf16 %v320_v27, %v319_v26  ;;  %v221_v33 = vadd.f32 %v1837_v3, %v220_v29  ;;  %v325_v42 = vmax.f32 %v229_v35, 0.0 }
  0xde   :  { %v1386_v32 = vpop.f32.mrf.mxu0 }
  0xdf   :  { %v232_v34 = vadd.f32 %v1386_v32, %v1837_v3  ;;  %1427 = vmatprep.mubr.bf16.mxu1 %v349_v30  ;;  %v323_v40 = vmax.f32 %v221_v33, 0.0 }
  0xe0   :  { %v223_v36 = vpop.f32.mrf.mxu0  ;;  %1428 = vmatmul.mubr.bf16.gmra.mxu1 %v350_v31 }
  0xe1   :  { %v224_v37 = vadd.f32 %v1837_v3, %v223_v36  ;;  %v326_v38 = vmax.f32 %v232_v34, 0.0 }
  0xe2   :  { %v1389_v39 = vpop.f32.mrf.mxu0 }
  0xe3   :  { %v324_v41 = vmax.f32 %v224_v37, 0.0  ;;  %v352_v45 = vpack.c.bf16 %v326_v38, %v325_v42  ;;  %v245_v49 = vadd.f32 %v1389_v39, %v1837_v3 }
  0xe4   :  { %v236_v43 = vpop.f32.mrf.mxu0 }
  0xe5   :  { %v351_v44 = vpack.c.bf16 %v324_v41, %v323_v40  ;;  %v237_v47 = vadd.f32 %v1837_v3, %v236_v43  ;;  %v329_v56 = vmax.f32 %v245_v49, 0.0 }
  0xe6   :  { %v1390_v46 = vpop.f32.mrf.mxu0 }
  0xe7   :  { %v248_v48 = vadd.f32 %v1390_v46, %v1837_v3  ;;  %1431 = vmatprep.mubr.bf16.mxu1 %v351_v44  ;;  %v327_v54 = vmax.f32 %v237_v47, 0.0 }
  0xe8   :  { %v239_v50 = vpop.f32.mrf.mxu0  ;;  %1432 = vmatmul.mubr.bf16.gmra.mxu1 %v352_v45 }
  0xe9   :  { %v240_v51 = vadd.f32 %v1837_v3, %v239_v50  ;;  %v330_v52 = vmax.f32 %v248_v48, 0.0 }
  0xea   :  { %v1393_v53 = vpop.f32.mrf.mxu0 }
  0xeb   :  { %v328_v55 = vmax.f32 %v240_v51, 0.0  ;;  %v354_v59 = vpack.c.bf16 %v330_v52, %v329_v56  ;;  %v261_v63 = vadd.f32 %v1393_v53, %v1837_v3  ;;  %v1587_v51 = vld [vmem:[%s2035_s5] sm:$0xff]   ;;  %v1588_v52 = vld [vmem:[%s2037_s7 + $0x38] sm:$0xff]   ;;  %v1590_v53 = vld [vmem:[%s2037_s7 + $0x28] sm:$0xff]  }
  0xec   :  { %v252_v57 = vpop.f32.mrf.mxu0  ;;  %1469 = vmatprep.subr.bf16.mxu0 %v1587_v51  ;;  %1551 = vmatprep.subr.bf16.mxu1 %v1588_v52  ;;  %v1899_v56 = vld [vmem:[%s2037_s7 + $0x10] sm:$0xff]  }
  0xed   :  { %v353_v58 = vpack.c.bf16 %v328_v55, %v327_v54  ;;  %v253_v61 = vadd.f32 %v1837_v3, %v252_v57  ;;  %v333_v7 = vmax.f32 %v261_v63, 0.0  ;;  %1470 = vmatpush3.bf16.msra.mxu0 %v1587_v51  ;;  %1559 = vmatpush3.bf16.msra.mxu1 %v1588_v52  ;;  %v1886_v54 = vld [vmem:[%s2037_s7 + $0x20] sm:$0xff]   ;;  %v1892_v55 = vld [vmem:[%s2037_s7 + $0x18] sm:$0xff]  }
  0xee   :  { %v1394_v60 = vpop.f32.mrf.mxu0  ;;  %1503 = vmatprep.subr.bf16.mxu0 %v1588_v52 }
  0xef   :  { %v264_v62 = vadd.f32 %v1394_v60, %v1837_v3  ;;  %1435 = vmatprep.mubr.bf16.mxu1 %v353_v58  ;;  %v331_v5 = vmax.f32 %v253_v61, 0.0 }
  0xf0   :  { %v255_v0 = vpop.f32.mrf.mxu0  ;;  %1436 = vmatmul.mubr.bf16.gmra.mxu1 %v354_v59  ;;  %v1907_v59 = vld [vmem:[%s2034_s4] ss:$0 sm:$0xff] }
  0xf1   :  { %v256_v1 = vadd.f32 %v1837_v3, %v255_v0  ;;  %v334_v2 = vmax.f32 %v264_v62, 0.0 }
  0xf2   :  { %v1397_v4 = vpop.f32.mrf.mxu0 }
  0xf3   :  { %v332_v6 = vmax.f32 %v256_v1, 0.0  ;;  %v356_v10 = vpack.c.bf16 %v334_v2, %v333_v7  ;;  %v277_v14 = vadd.f32 %v1397_v4, %v1837_v3 }
  0xf4   :  { %v268_v8 = vpop.f32.mrf.mxu0 }
  0xf5   :  { %v355_v9 = vpack.c.bf16 %v332_v6, %v331_v5  ;;  %v269_v12 = vadd.f32 %v1837_v3, %v268_v8  ;;  %v337_v21 = vmax.f32 %v277_v14, 0.0 }
  0xf6   :  { %v1398_v11 = vpop.f32.mrf.mxu0 }
  0xf7   :  { %v280_v13 = vadd.f32 %v1398_v11, %v1837_v3  ;;  %1439 = vmatprep.mubr.bf16.mxu1 %v355_v9  ;;  %v335_v19 = vmax.f32 %v269_v12, 0.0 }
  0xf8   :  { %v271_v15 = vpop.f32.mrf.mxu0  ;;  %1440 = vmatmul.mubr.bf16.gmra.mxu1 %v356_v10 }
  0xf9   :  { %v272_v16 = vadd.f32 %v1837_v3, %v271_v15  ;;  %v338_v17 = vmax.f32 %v280_v13, 0.0 }
  0xfa   :  { %v1401_v18 = vpop.f32.mrf.mxu0 }
  0xfb   :  { %v336_v20 = vmax.f32 %v272_v16, 0.0  ;;  %v358_v24 = vpack.c.bf16 %v338_v17, %v337_v21  ;;  %v293_v28 = vadd.f32 %v1401_v18, %v1837_v3 }
  0xfc   :  { %v284_v22 = vpop.f32.mrf.mxu0 }
  0xfd   :  { %v357_v23 = vpack.c.bf16 %v336_v20, %v335_v19  ;;  %v285_v26 = vadd.f32 %v1837_v3, %v284_v22  ;;  %v341_v35 = vmax.f32 %v293_v28, 0.0 }
  0xfe   :  { %v1402_v25 = vpop.f32.mrf.mxu0 }
  0xff   :  { %v296_v27 = vadd.f32 %v1402_v25, %v1837_v3  ;;  %1443 = vmatprep.mubr.bf16.mxu1 %v357_v23  ;;  %v339_v33 = vmax.f32 %v285_v26, 0.0 }
 0x100   :  { %v287_v29 = vpop.f32.mrf.mxu0  ;;  %1444 = vmatmul.mubr.bf16.gmra.mxu1 %v358_v24 }
 0x101   :  { %v288_v30 = vadd.f32 %v1837_v3, %v287_v29  ;;  %v342_v31 = vmax.f32 %v296_v27, 0.0 }
 0x102   :  { %v1405_v32 = vpop.f32.mrf.mxu0 }
 0x103   :  { %v340_v34 = vmax.f32 %v288_v30, 0.0  ;;  %v360_v38 = vpack.c.bf16 %v342_v31, %v341_v35  ;;  %v309_v42 = vadd.f32 %v1405_v32, %v1837_v3 }
 0x104   :  { %v300_v36 = vpop.f32.mrf.mxu0 }
 0x105   :  { %v359_v37 = vpack.c.bf16 %v340_v34, %v339_v33  ;;  %v301_v40 = vadd.f32 %v1837_v3, %v300_v36  ;;  %v345_v48 = vmax.f32 %v309_v42, 0.0 }
 0x106   :  { %v1406_v39 = vpop.f32.mrf.mxu0 }
 0x107   :  { %v312_v41 = vadd.f32 %v1406_v39, %v1837_v3  ;;  %1447 = vmatprep.mubr.bf16.mxu1 %v359_v37  ;;  %v343_v46 = vmax.f32 %v301_v40, 0.0 }
 0x108   :  { %v303_v43 = vpop.f32.mrf.mxu0  ;;  %1448 = vmatmul.mubr.bf16.gmra.mxu1 %v360_v38 }
 0x109   :  { %v304_v44 = vadd.f32 %v1837_v3, %v303_v43  ;;  %v346_v45 = vmax.f32 %v312_v41, 0.0  ;;  %v1589_v3 = vld [vmem:[%s2037_s7 + $0x30] sm:$0xff]  }
 0x10a   :  { %1552 = vmatprep.subr.bf16.mxu1 %v1589_v3 }
 0x10b   :  { %v344_v47 = vmax.f32 %v304_v44, 0.0  ;;  %v362_v50 = vpack.c.bf16 %v346_v45, %v345_v48  ;;  %1560 = vmatpush3.bf16.msra.mxu1 %v1589_v3 }
 0x10c   :  { %1553 = vmatprep.subr.bf16.mxu1 %v1590_v53 }
 0x10d   :  { %v361_v49 = vpack.c.bf16 %v344_v47, %v343_v46 }
 0x10f   :  { %1451 = vmatprep.mubr.bf16.mxu1 %v361_v49  ;;  %1561 = vmatpush3.bf16.msra.mxu1 %v1590_v53 }
 0x110   :  { %1452 = vmatmul.mubr.bf16.gmra.mxu1 %v362_v50  ;;  %1554 = vmatprep.subr.bf16.mxu1 %v1886_v54 }
 0x113   :  { %1562 = vmatpush3.bf16.msra.mxu1 %v1886_v54 }
 0x114   :  { %1555 = vmatprep.subr.bf16.mxu1 %v1892_v55 }
 0x117   :  { %1563 = vmatpush3.bf16.msra.mxu1 %v1892_v55 }
 0x118   :  { %1556 = vmatprep.subr.bf16.mxu1 %v1899_v56 }
 0x11b   :  { %1564 = vmatpush3.bf16.msra.mxu1 %v1899_v56 }
 0x198   :  { %v1425_v57 = vpop.f32.mrf.mxu1 }
 0x199   :  { %v477_v63 = vadd.f32 %v1425_v57, %v1907_v59 }
 0x19a   :  { %v468_v58 = vpop.f32.mrf.mxu1 }
 0x19b   :  { %v469_v61 = vadd.f32 %v1907_v59, %v468_v58  ;;  %v597_v7 = vmax.f32 %v477_v63, 0.0 }
 0x19c   :  { %v1426_v60 = vpop.f32.mrf.mxu1 }
 0x19d   :  { %v480_v62 = vadd.f32 %v1426_v60, %v1907_v59  ;;  %v595_v5 = vmax.f32 %v469_v61, 0.0 }
 0x19e   :  { %v471_v0 = vpop.f32.mrf.mxu1 }
 0x19f   :  { %v472_v1 = vadd.f32 %v1907_v59, %v471_v0  ;;  %v598_v2 = vmax.f32 %v480_v62, 0.0 }
 0x1a0   :  { %v1429_v4 = vpop.f32.mrf.mxu1 }
 0x1a1   :  { %v596_v6 = vmax.f32 %v472_v1, 0.0  ;;  %v628_v10 = vpack.c.bf16 %v598_v2, %v597_v7  ;;  %v493_v14 = vadd.f32 %v1429_v4, %v1907_v59 }
 0x1a2   :  { %v484_v8 = vpop.f32.mrf.mxu1 }
 0x1a3   :  { %v627_v9 = vpack.c.bf16 %v596_v6, %v595_v5  ;;  %v485_v12 = vadd.f32 %v1907_v59, %v484_v8  ;;  %v601_v21 = vmax.f32 %v493_v14, 0.0 }
 0x1a4   :  { %v1430_v11 = vpop.f32.mrf.mxu1 }
 0x1a5   :  { %v496_v13 = vadd.f32 %v1430_v11, %v1907_v59  ;;  %1471 = vmatprep.mubr.bf16.mxu0 %v627_v9  ;;  %v599_v19 = vmax.f32 %v485_v12, 0.0 }
 0x1a6   :  { %v487_v15 = vpop.f32.mrf.mxu1  ;;  %1472 = vmatmul.mubr.bf16.vlgmr.msra.gmra.mxu0 %v628_v10 }
 0x1a7   :  { %v488_v16 = vadd.f32 %v1907_v59, %v487_v15  ;;  %1504 = vmatpush3.bf16.msra.mxu0 %v1588_v52  ;;  %v602_v17 = vmax.f32 %v496_v13, 0.0 }
 0x1a8   :  { %v1433_v18 = vpop.f32.mrf.mxu1  ;;  %1505 = vmatprep.subr.bf16.mxu0 %v1589_v3 }
 0x1a9   :  { %v600_v20 = vmax.f32 %v488_v16, 0.0  ;;  %v630_v24 = vpack.c.bf16 %v602_v17, %v601_v21  ;;  %v509_v28 = vadd.f32 %v1433_v18, %v1907_v59 }
 0x1aa   :  { %v500_v22 = vpop.f32.mrf.mxu1 }
 0x1ab   :  { %v629_v23 = vpack.c.bf16 %v600_v20, %v599_v19  ;;  %1506 = vmatpush3.bf16.msra.mxu0 %v1589_v3  ;;  %v501_v26 = vadd.f32 %v1907_v59, %v500_v22  ;;  %v605_v35 = vmax.f32 %v509_v28, 0.0 }
 0x1ac   :  { %v1434_v25 = vpop.f32.mrf.mxu1  ;;  %1507 = vmatprep.subr.bf16.mxu0 %v1590_v53 }
 0x1ad   :  { %v512_v27 = vadd.f32 %v1434_v25, %v1907_v59  ;;  %1475 = vmatprep.mubr.bf16.mxu0 %v629_v23  ;;  %v603_v33 = vmax.f32 %v501_v26, 0.0 }
 0x1ae   :  { %v503_v29 = vpop.f32.mrf.mxu1  ;;  %1476 = vmatmul.mubr.bf16.gmra.mxu0 %v630_v24 }
 0x1af   :  { %v504_v30 = vadd.f32 %v1907_v59, %v503_v29  ;;  %1508 = vmatpush3.bf16.msra.mxu0 %v1590_v53  ;;  %v606_v31 = vmax.f32 %v512_v27, 0.0 }
 0x1b0   :  { %v1437_v32 = vpop.f32.mrf.mxu1  ;;  %1509 = vmatprep.subr.bf16.mxu0 %v1886_v54 }
 0x1b1   :  { %v604_v34 = vmax.f32 %v504_v30, 0.0  ;;  %v632_v38 = vpack.c.bf16 %v606_v31, %v605_v35  ;;  %v525_v42 = vadd.f32 %v1437_v32, %v1907_v59 }
 0x1b2   :  { %v516_v36 = vpop.f32.mrf.mxu1 }
 0x1b3   :  { %v631_v37 = vpack.c.bf16 %v604_v34, %v603_v33  ;;  %1510 = vmatpush3.bf16.msra.mxu0 %v1886_v54  ;;  %v517_v40 = vadd.f32 %v1907_v59, %v516_v36  ;;  %v609_v49 = vmax.f32 %v525_v42, 0.0 }
 0x1b4   :  { %v1438_v39 = vpop.f32.mrf.mxu1  ;;  %1511 = vmatprep.subr.bf16.mxu0 %v1892_v55 }
 0x1b5   :  { %v528_v41 = vadd.f32 %v1438_v39, %v1907_v59  ;;  %1479 = vmatprep.mubr.bf16.mxu0 %v631_v37  ;;  %v607_v47 = vmax.f32 %v517_v40, 0.0 }
 0x1b6   :  { %v519_v43 = vpop.f32.mrf.mxu1  ;;  %1480 = vmatmul.mubr.bf16.gmra.mxu0 %v632_v38 }
 0x1b7   :  { %v520_v44 = vadd.f32 %v1907_v59, %v519_v43  ;;  %1512 = vmatpush3.bf16.msra.mxu0 %v1892_v55  ;;  %v610_v45 = vmax.f32 %v528_v41, 0.0 }
 0x1b8   :  { %v1441_v46 = vpop.f32.mrf.mxu1  ;;  %1513 = vmatprep.subr.bf16.mxu0 %v1899_v56 }
 0x1b9   :  { %v608_v48 = vmax.f32 %v520_v44, 0.0  ;;  %v634_v52 = vpack.c.bf16 %v610_v45, %v609_v49  ;;  %v541_v55 = vadd.f32 %v1441_v46, %v1907_v59  ;;  %v1594_v44 = vld [vmem:[%s2037_s7 + $0x8] sm:$0xff]  }
 0x1ba   :  { %v532_v50 = vpop.f32.mrf.mxu1  ;;  %1557 = vmatprep.subr.bf16.mxu1 %v1594_v44 }
 0x1bb   :  { %v633_v51 = vpack.c.bf16 %v608_v48, %v607_v47  ;;  %1514 = vmatpush3.bf16.msra.mxu0 %v1899_v56  ;;  %v533_v53 = vadd.f32 %v1907_v59, %v532_v50  ;;  %v613_v0 = vmax.f32 %v541_v55, 0.0  ;;  %1565 = vmatpush3.bf16.msra.mxu1 %v1594_v44  ;;  %v1956_v47 = vld [vmem:[%s2036_s6] ss:$0 sm:$0xff] }
 0x1bc   :  { %v1442_v3 = vpop.f32.mrf.mxu1  ;;  %1515 = vmatprep.subr.bf16.mxu0 %v1594_v44 }
 0x1bd   :  { %v544_v54 = vadd.f32 %v1442_v3, %v1907_v59  ;;  %1483 = vmatprep.mubr.bf16.mxu0 %v633_v51  ;;  %v611_v62 = vmax.f32 %v533_v53, 0.0 }
 0x1be   :  { %v535_v57 = vpop.f32.mrf.mxu1  ;;  %1484 = vmatmul.mubr.bf16.gmra.mxu0 %v634_v52 }
 0x1bf   :  { %v536_v58 = vadd.f32 %v1907_v59, %v535_v57  ;;  %v614_v60 = vmax.f32 %v544_v54, 0.0  ;;  %1516 = vmatpush3.bf16.msra.mxu0 %v1594_v44 }
 0x1c0   :  { %v1445_v61 = vpop.f32.mrf.mxu1 }
 0x1c1   :  { %v612_v63 = vmax.f32 %v536_v58, 0.0  ;;  %v636_v2 = vpack.c.bf16 %v614_v60, %v613_v0  ;;  %v557_v7 = vadd.f32 %v1445_v61, %v1907_v59 }
 0x1c2   :  { %v548_v1 = vpop.f32.mrf.mxu1 }
 0x1c3   :  { %v635_v56 = vpack.c.bf16 %v612_v63, %v611_v62  ;;  %v549_v5 = vadd.f32 %v1907_v59, %v548_v1  ;;  %v617_v14 = vmax.f32 %v557_v7, 0.0 }
 0x1c4   :  { %v1446_v4 = vpop.f32.mrf.mxu1 }
 0x1c5   :  { %v560_v6 = vadd.f32 %v1446_v4, %v1907_v59  ;;  %1487 = vmatprep.mubr.bf16.mxu0 %v635_v56  ;;  %v615_v12 = vmax.f32 %v549_v5, 0.0 }
 0x1c6   :  { %v551_v8 = vpop.f32.mrf.mxu1  ;;  %1488 = vmatmul.mubr.bf16.gmra.mxu0 %v636_v2 }
 0x1c7   :  { %v552_v9 = vadd.f32 %v1907_v59, %v551_v8  ;;  %v618_v10 = vmax.f32 %v560_v6, 0.0 }
 0x1c8   :  { %v1449_v11 = vpop.f32.mrf.mxu1 }
 0x1c9   :  { %v616_v13 = vmax.f32 %v552_v9, 0.0  ;;  %v638_v17 = vpack.c.bf16 %v618_v10, %v617_v14  ;;  %v573_v21 = vadd.f32 %v1449_v11, %v1907_v59 }
 0x1ca   :  { %v564_v15 = vpop.f32.mrf.mxu1 }
 0x1cb   :  { %v637_v16 = vpack.c.bf16 %v616_v13, %v615_v12  ;;  %v565_v19 = vadd.f32 %v1907_v59, %v564_v15  ;;  %v621_v28 = vmax.f32 %v573_v21, 0.0 }
 0x1cc   :  { %v1450_v18 = vpop.f32.mrf.mxu1 }
 0x1cd   :  { %v576_v20 = vadd.f32 %v1450_v18, %v1907_v59  ;;  %1491 = vmatprep.mubr.bf16.mxu0 %v637_v16  ;;  %v619_v26 = vmax.f32 %v565_v19, 0.0 }
 0x1ce   :  { %v567_v22 = vpop.f32.mrf.mxu1  ;;  %1492 = vmatmul.mubr.bf16.gmra.mxu0 %v638_v17 }
 0x1cf   :  { %v568_v23 = vadd.f32 %v1907_v59, %v567_v22  ;;  %v622_v24 = vmax.f32 %v576_v20, 0.0 }
 0x1d0   :  { %v1453_v25 = vpop.f32.mrf.mxu1 }
 0x1d1   :  { %v620_v27 = vmax.f32 %v568_v23, 0.0  ;;  %v640_v31 = vpack.c.bf16 %v622_v24, %v621_v28  ;;  %v589_v35 = vadd.f32 %v1453_v25, %v1907_v59 }
 0x1d2   :  { %v580_v29 = vpop.f32.mrf.mxu1 }
 0x1d3   :  { %v639_v30 = vpack.c.bf16 %v620_v27, %v619_v26  ;;  %v581_v33 = vadd.f32 %v1907_v59, %v580_v29  ;;  %v625_v41 = vmax.f32 %v589_v35, 0.0 }
 0x1d4   :  { %v1454_v32 = vpop.f32.mrf.mxu1 }
 0x1d5   :  { %v592_v34 = vadd.f32 %v1454_v32, %v1907_v59  ;;  %1495 = vmatprep.mubr.bf16.mxu0 %v639_v30  ;;  %v623_v39 = vmax.f32 %v581_v33, 0.0 }
 0x1d6   :  { %v583_v36 = vpop.f32.mrf.mxu1  ;;  %1496 = vmatmul.mubr.bf16.gmra.mxu0 %v640_v31 }
 0x1d7   :  { %v584_v37 = vadd.f32 %v1907_v59, %v583_v36  ;;  %v626_v38 = vmax.f32 %v592_v34, 0.0  ;;  %v1595_v59 = vld [vmem:[%s2037_s7] sm:$0xff]  }
 0x1d8   :  { %1517 = vmatprep.subr.bf16.mxu0 %v1595_v59  ;;  %1558 = vmatprep.subr.bf16.mxu1 %v1595_v59 }
 0x1d9   :  { %v624_v40 = vmax.f32 %v584_v37, 0.0  ;;  %v642_v43 = vpack.c.bf16 %v626_v38, %v625_v41  ;;  %1518 = vmatpush3.bf16.msra.mxu0 %v1595_v59  ;;  %1566 = vmatpush3.bf16.msra.mxu1 %v1595_v59 }
 0x1db   :  { %v641_v42 = vpack.c.bf16 %v624_v40, %v623_v39 }
 0x1dd   :  { %1499 = vmatprep.mubr.bf16.mxu0 %v641_v42 }
 0x1de   :  { %1500 = vmatmul.mubr.bf16.gmra.mxu0 %v642_v43 }
 0x266   :  { %v1473_v45 = vpop.f32.mrf.mxu0 }
 0x267   :  { %v757_v51 = vadd.f32 %v1473_v45, %v1956_v47 }
 0x268   :  { %v748_v46 = vpop.f32.mrf.mxu0 }
 0x269   :  { %v749_v49 = vadd.f32 %v1956_v47, %v748_v46  ;;  %v877_v58 = vmax.f32 %v757_v51, 0.0 }
 0x26a   :  { %v1474_v48 = vpop.f32.mrf.mxu0 }
 0x26b   :  { %v760_v50 = vadd.f32 %v1474_v48, %v1956_v47  ;;  %v875_v55 = vmax.f32 %v749_v49, 0.0 }
 0x26c   :  { %v751_v52 = vpop.f32.mrf.mxu0 }
 0x26d   :  { %v752_v3 = vadd.f32 %v1956_v47, %v751_v52  ;;  %v878_v53 = vmax.f32 %v760_v50, 0.0 }
 0x26e   :  { %v1477_v54 = vpop.f32.mrf.mxu0 }
 0x26f   :  { %v876_v57 = vmax.f32 %v752_v3, 0.0  ;;  %v908_v62 = vpack.c.bf16 %v878_v53, %v877_v58  ;;  %v773_v56 = vadd.f32 %v1477_v54, %v1956_v47 }
 0x270   :  { %v764_v60 = vpop.f32.mrf.mxu0 }
 0x271   :  { %v907_v61 = vpack.c.bf16 %v876_v57, %v875_v55  ;;  %v765_v0 = vadd.f32 %v1956_v47, %v764_v60  ;;  %v881_v9 = vmax.f32 %v773_v56, 0.0 }
 0x272   :  { %v1478_v63 = vpop.f32.mrf.mxu0 }
 0x273   :  { %v776_v1 = vadd.f32 %v1478_v63, %v1956_v47  ;;  %1519 = vmatprep.mubr.bf16.mxu0 %v907_v61  ;;  %v879_v7 = vmax.f32 %v765_v0, 0.0 }
 0x274   :  { %v767_v2 = vpop.f32.mrf.mxu0  ;;  %1520 = vmatmul.mubr.bf16.vlgmr.msra.gmra.mxu0 %v908_v62 }
 0x275   :  { %v768_v4 = vadd.f32 %v1956_v47, %v767_v2  ;;  %v882_v5 = vmax.f32 %v776_v1, 0.0 }
 0x276   :  { %v1481_v6 = vpop.f32.mrf.mxu0 }
 0x277   :  { %v880_v8 = vmax.f32 %v768_v4, 0.0  ;;  %v910_v12 = vpack.c.bf16 %v882_v5, %v881_v9  ;;  %v789_v16 = vadd.f32 %v1481_v6, %v1956_v47 }
 0x278   :  { %v780_v10 = vpop.f32.mrf.mxu0 }
 0x279   :  { %v909_v11 = vpack.c.bf16 %v880_v8, %v879_v7  ;;  %v781_v14 = vadd.f32 %v1956_v47, %v780_v10  ;;  %v885_v23 = vmax.f32 %v789_v16, 0.0 }
 0x27a   :  { %v1482_v13 = vpop.f32.mrf.mxu0 }
 0x27b   :  { %v792_v15 = vadd.f32 %v1482_v13, %v1956_v47  ;;  %1523 = vmatprep.mubr.bf16.mxu1 %v909_v11  ;;  %v883_v21 = vmax.f32 %v781_v14, 0.0 }
 0x27c   :  { %v783_v17 = vpop.f32.mrf.mxu0  ;;  %1524 = vmatmul.mubr.bf16.vlgmr.msra.gmra.mxu1 %v910_v12 }
 0x27d   :  { %v784_v18 = vadd.f32 %v1956_v47, %v783_v17  ;;  %v886_v19 = vmax.f32 %v792_v15, 0.0 }
 0x27e   :  { %v1485_v20 = vpop.f32.mrf.mxu0 }
 0x27f   :  { %v884_v22 = vmax.f32 %v784_v18, 0.0  ;;  %v912_v26 = vpack.c.bf16 %v886_v19, %v885_v23  ;;  %v805_v30 = vadd.f32 %v1485_v20, %v1956_v47 }
 0x280   :  { %v796_v24 = vpop.f32.mrf.mxu0 }
 0x281   :  { %v911_v25 = vpack.c.bf16 %v884_v22, %v883_v21  ;;  %v797_v28 = vadd.f32 %v1956_v47, %v796_v24  ;;  %v889_v37 = vmax.f32 %v805_v30, 0.0 }
 0x282   :  { %v1486_v27 = vpop.f32.mrf.mxu0 }
 0x283   :  { %v808_v29 = vadd.f32 %v1486_v27, %v1956_v47  ;;  %1527 = vmatprep.mubr.bf16.mxu1 %v911_v25  ;;  %v887_v35 = vmax.f32 %v797_v28, 0.0 }
 0x284   :  { %v799_v31 = vpop.f32.mrf.mxu0  ;;  %1528 = vmatmul.mubr.bf16.gmra.mxu1 %v912_v26 }
 0x285   :  { %v800_v32 = vadd.f32 %v1956_v47, %v799_v31  ;;  %v890_v33 = vmax.f32 %v808_v29, 0.0 }
 0x286   :  { %v1489_v34 = vpop.f32.mrf.mxu0 }
 0x287   :  { %v888_v36 = vmax.f32 %v800_v32, 0.0  ;;  %v914_v40 = vpack.c.bf16 %v890_v33, %v889_v37  ;;  %v821_v44 = vadd.f32 %v1489_v34, %v1956_v47  ;;  %v1993_v32 = vld [vmem:[%s2038_s8] ss:$0 sm:$0xff]  ;;  %s1618_s8 = smov [#allocation2]  }
 0x288   :  { %v812_v38 = vpop.f32.mrf.mxu0  ;;  %s1224_s14 = sshll.u32 %s1618_s8, 4  ;;  %s1225_s14 = int_to_ptr.vmem [resolvable:$true] %s1224_s14 }
 0x289   :  { %v913_v39 = vpack.c.bf16 %v888_v36, %v887_v35  ;;  %v813_v42 = vadd.f32 %v1956_v47, %v812_v38  ;;  %v893_v51 = vmax.f32 %v821_v44, 0.0  ;;  %s1596_s15 = scalar_lea.vmem %s1225_s14, 4096  ;;  %p1601_p1 = scmp.lt.s32.totalorder %s1225_s14, %s1225_s14 }
 0x28a   :  { %v1490_v41 = vpop.f32.mrf.mxu0  ;;  %p1597_p0 = scmp.ne.s32.totalorder %s1225_s14, %s1596_s15  ;;  %p1602_p2 = scmp.lt.s32.totalorder %s1596_s15, %s1596_s15 }
 0x28b   :  { %v824_v43 = vadd.f32 %v1490_v41, %v1956_v47  ;;  %1531 = vmatprep.mubr.bf16.mxu1 %v913_v39  ;;  %v891_v49 = vmax.f32 %v813_v42, 0.0 }
 0x28c   :  { %v815_v59 = vpop.f32.mrf.mxu0  ;;  %1532 = vmatmul.mubr.bf16.gmra.mxu1 %v914_v40  ;;  %p1603_p3 = por %p1602_p2, %p1601_p1 }
 0x28d   :  { %v816_v45 = vadd.f32 %v1956_v47, %v815_v59  ;;  %v894_v46 = vmax.f32 %v824_v43, 0.0 }
 0x28e   :  { %v1493_v48 = vpop.f32.mrf.mxu0  ;;  %p1604_p4 = pnand %p1603_p3, %p1597_p0 }
 0x28f   :  { %v892_v50 = vmax.f32 %v816_v45, 0.0  ;;  %v916_v53 = vpack.c.bf16 %v894_v46, %v893_v51  ;;  %v837_v58 = vadd.f32 %v1493_v48, %v1956_v47 }
 0x290   :  { %v828_v52 = vpop.f32.mrf.mxu0 }
 0x291   :  { %v915_v3 = vpack.c.bf16 %v892_v50, %v891_v49  ;;  %v829_v55 = vadd.f32 %v1956_v47, %v828_v52  ;;  %v897_v56 = vmax.f32 %v837_v58, 0.0 }
 0x292   :  { %v1494_v54 = vpop.f32.mrf.mxu0 }
 0x293   :  { %v840_v57 = vadd.f32 %v1494_v54, %v1956_v47  ;;  %1535 = vmatprep.mubr.bf16.mxu1 %v915_v3  ;;  %v895_v0 = vmax.f32 %v829_v55, 0.0 }
 0x294   :  { %v831_v60 = vpop.f32.mrf.mxu0  ;;  %1536 = vmatmul.mubr.bf16.gmra.mxu1 %v916_v53 }
 0x295   :  { %v832_v61 = vadd.f32 %v1956_v47, %v831_v60  ;;  %v898_v62 = vmax.f32 %v840_v57, 0.0 }
 0x296   :  { %v1497_v63 = vpop.f32.mrf.mxu0 }
 0x297   :  { %v896_v1 = vmax.f32 %v832_v61, 0.0  ;;  %v918_v5 = vpack.c.bf16 %v898_v62, %v897_v56  ;;  %v853_v9 = vadd.f32 %v1497_v63, %v1956_v47 }
 0x298   :  { %v844_v2 = vpop.f32.mrf.mxu0 }
 0x299   :  { %v917_v4 = vpack.c.bf16 %v896_v1, %v895_v0  ;;  %v845_v7 = vadd.f32 %v1956_v47, %v844_v2  ;;  %v901_v16 = vmax.f32 %v853_v9, 0.0 }
 0x29a   :  { %v1498_v6 = vpop.f32.mrf.mxu0 }
 0x29b   :  { %v856_v8 = vadd.f32 %v1498_v6, %v1956_v47  ;;  %1539 = vmatprep.mubr.bf16.mxu1 %v917_v4  ;;  %v899_v14 = vmax.f32 %v845_v7, 0.0 }
 0x29c   :  { %v847_v10 = vpop.f32.mrf.mxu0  ;;  %1540 = vmatmul.mubr.bf16.gmra.mxu1 %v918_v5 }
 0x29d   :  { %v848_v11 = vadd.f32 %v1956_v47, %v847_v10  ;;  %v902_v12 = vmax.f32 %v856_v8, 0.0 }
 0x29e   :  { %v1501_v13 = vpop.f32.mrf.mxu0 }
 0x29f   :  { %v900_v15 = vmax.f32 %v848_v11, 0.0  ;;  %v920_v19 = vpack.c.bf16 %v902_v12, %v901_v16  ;;  %v869_v23 = vadd.f32 %v1501_v13, %v1956_v47 }
 0x2a0   :  { %v860_v17 = vpop.f32.mrf.mxu0 }
 0x2a1   :  { %v919_v18 = vpack.c.bf16 %v900_v15, %v899_v14  ;;  %v861_v21 = vadd.f32 %v1956_v47, %v860_v17  ;;  %v905_v29 = vmax.f32 %v869_v23, 0.0 }
 0x2a2   :  { %v1502_v20 = vpop.f32.mrf.mxu0 }
 0x2a3   :  { %v872_v22 = vadd.f32 %v1502_v20, %v1956_v47  ;;  %1543 = vmatprep.mubr.bf16.mxu1 %v919_v18  ;;  %v903_v27 = vmax.f32 %v861_v21, 0.0 }
 0x2a4   :  { %v863_v24 = vpop.f32.mrf.mxu0  ;;  %1544 = vmatmul.mubr.bf16.gmra.mxu1 %v920_v19 }
 0x2a5   :  { %v864_v25 = vadd.f32 %v1956_v47, %v863_v24  ;;  %v906_v26 = vmax.f32 %v872_v22, 0.0 }
 0x2a7   :  { %v904_v28 = vmax.f32 %v864_v25, 0.0  ;;  %v922_v31 = vpack.c.bf16 %v906_v26, %v905_v29 }
 0x2a9   :  { %v921_v30 = vpack.c.bf16 %v904_v28, %v903_v27 }
 0x2ab   :  { %1547 = vmatprep.mubr.bf16.mxu1 %v921_v30 }
 0x2ac   :  { %1548 = vmatmul.mubr.bf16.gmra.mxu1 %v922_v31 }
 0x334   :  { %v1521_v33 = vpop.f32.mrf.mxu0 }
 0x335   :  { %v1037_v34 = vadd.f32 %v1521_v33, %v1993_v32 }
 0x336   :  { %v1028_v35 = vpop.f32.mrf.mxu0 }
 0x337   :  { %v1157_v36 = vmax.f32 %v1037_v34, 0.0  ;;  %v1029_v47 = vadd.f32 %v1993_v32, %v1028_v35 }
 0x338   :  { %v1522_v37 = vpop.f32.mrf.mxu0 }
 0x339   :  { %1189 = vst [vmem:[#allocation2 + $0x10] sm:$0xff] %v1157_v36  ;;  %v1155_v38 = vmax.f32 %v1029_v47, 0.0  ;;  %v1040_v39 = vadd.f32 %v1522_v37, %v1993_v32 }
 0x33a   :  { %v1031_v40 = vpop.f32.mrf.mxu0 }
 0x33b   :  { %1187 = vst [vmem:[#allocation2] sm:$0xff] %v1155_v38  ;;  %v1158_v41 = vmax.f32 %v1040_v39, 0.0  ;;  %v1032_v42 = vadd.f32 %v1993_v32, %v1031_v40 }
 0x33c   :  { %v1525_v43 = vpop.f32.mrf.mxu1 }
 0x33d   :  { %1190 = vst [vmem:[#allocation2 + $0x18] sm:$0xff] %v1158_v41  ;;  %v1156_v44 = vmax.f32 %v1032_v42, 0.0  ;;  %v1053_v59 = vadd.f32 %v1525_v43, %v1993_v32 }
 0x33e   :  { %v1044_v45 = vpop.f32.mrf.mxu1 }
 0x33f   :  { %1188 = vst [vmem:[#allocation2 + $0x8] sm:$0xff] %v1156_v44  ;;  %v1161_v46 = vmax.f32 %v1053_v59, 0.0  ;;  %v1045_v48 = vadd.f32 %v1993_v32, %v1044_v45 }
 0x340   :  { %v1526_v49 = vpop.f32.mrf.mxu1 }
 0x341   :  { %1193 = vst [vmem:[#allocation2 + $0x30] sm:$0xff] %v1161_v46  ;;  %v1159_v50 = vmax.f32 %v1045_v48, 0.0  ;;  %v1056_v51 = vadd.f32 %v1526_v49, %v1993_v32 }
 0x342   :  { %v1047_v52 = vpop.f32.mrf.mxu1 }
 0x343   :  { %1191 = vst [vmem:[#allocation2 + $0x20] sm:$0xff] %v1159_v50  ;;  %v1162_v3 = vmax.f32 %v1056_v51, 0.0  ;;  %v1048_v53 = vadd.f32 %v1993_v32, %v1047_v52 }
 0x344   :  { %v1529_v54 = vpop.f32.mrf.mxu1 }
 0x345   :  { %1194 = vst [vmem:[#allocation2 + $0x38] sm:$0xff] %v1162_v3  ;;  %v1160_v55 = vmax.f32 %v1048_v53, 0.0  ;;  %v1069_v57 = vadd.f32 %v1529_v54, %v1993_v32 }
 0x346   :  { %v1060_v58 = vpop.f32.mrf.mxu1 }
 0x347   :  { %1192 = vst [vmem:[#allocation2 + $0x28] sm:$0xff] %v1160_v55  ;;  %v1165_v60 = vmax.f32 %v1069_v57, 0.0  ;;  %v1061_v61 = vadd.f32 %v1993_v32, %v1060_v58 }
 0x348   :  { %v1530_v62 = vpop.f32.mrf.mxu1 }
 0x349   :  { %1197 = vst [vmem:[#allocation2 + $0x50] sm:$0xff] %v1165_v60  ;;  %v1163_v63 = vmax.f32 %v1061_v61, 0.0  ;;  %v1072_v0 = vadd.f32 %v1530_v62, %v1993_v32 }
 0x34a   :  { %v1063_v1 = vpop.f32.mrf.mxu1 }
 0x34b   :  { %1195 = vst [vmem:[#allocation2 + $0x40] sm:$0xff] %v1163_v63  ;;  %v1166_v56 = vmax.f32 %v1072_v0, 0.0  ;;  %v1064_v2 = vadd.f32 %v1993_v32, %v1063_v1 }
 0x34c   :  { %v1533_v4 = vpop.f32.mrf.mxu1 }
 0x34d   :  { %1198 = vst [vmem:[#allocation2 + $0x58] sm:$0xff] %v1166_v56  ;;  %v1164_v5 = vmax.f32 %v1064_v2, 0.0  ;;  %v1085_v6 = vadd.f32 %v1533_v4, %v1993_v32 }
 0x34e   :  { %v1076_v7 = vpop.f32.mrf.mxu1 }
 0x34f   :  { %1196 = vst [vmem:[#allocation2 + $0x48] sm:$0xff] %v1164_v5  ;;  %v1169_v8 = vmax.f32 %v1085_v6, 0.0  ;;  %v1077_v9 = vadd.f32 %v1993_v32, %v1076_v7 }
 0x350   :  { %v1534_v10 = vpop.f32.mrf.mxu1 }
 0x351   :  { %1201 = vst [vmem:[#allocation2 + $0x70] sm:$0xff] %v1169_v8  ;;  %v1167_v11 = vmax.f32 %v1077_v9, 0.0  ;;  %v1088_v12 = vadd.f32 %v1534_v10, %v1993_v32 }
 0x352   :  { %v1079_v13 = vpop.f32.mrf.mxu1 }
 0x353   :  { %1199 = vst [vmem:[#allocation2 + $0x60] sm:$0xff] %v1167_v11  ;;  %v1170_v14 = vmax.f32 %v1088_v12, 0.0  ;;  %v1080_v15 = vadd.f32 %v1993_v32, %v1079_v13 }
 0x354   :  { %v1537_v16 = vpop.f32.mrf.mxu1 }
 0x355   :  { %1202 = vst [vmem:[#allocation2 + $0x78] sm:$0xff] %v1170_v14  ;;  %v1168_v17 = vmax.f32 %v1080_v15, 0.0  ;;  %v1101_v18 = vadd.f32 %v1537_v16, %v1993_v32 }
 0x356   :  { %v1092_v19 = vpop.f32.mrf.mxu1 }
 0x357   :  { %1200 = vst [vmem:[#allocation2 + $0x68] sm:$0xff] %v1168_v17  ;;  %v1173_v20 = vmax.f32 %v1101_v18, 0.0  ;;  %v1093_v21 = vadd.f32 %v1993_v32, %v1092_v19 }
 0x358   :  { %v1538_v22 = vpop.f32.mrf.mxu1 }
 0x359   :  { %1205 = vst [vmem:[#allocation2 + $0x90] sm:$0xff] %v1173_v20  ;;  %v1171_v23 = vmax.f32 %v1093_v21, 0.0  ;;  %v1104_v24 = vadd.f32 %v1538_v22, %v1993_v32 }
 0x35a   :  { %v1095_v25 = vpop.f32.mrf.mxu1 }
 0x35b   :  { %1203 = vst [vmem:[#allocation2 + $0x80] sm:$0xff] %v1171_v23  ;;  %v1174_v26 = vmax.f32 %v1104_v24, 0.0  ;;  %v1096_v27 = vadd.f32 %v1993_v32, %v1095_v25 }
 0x35c   :  { %v1541_v28 = vpop.f32.mrf.mxu1 }
 0x35d   :  { %1206 = vst [vmem:[#allocation2 + $0x98] sm:$0xff] %v1174_v26  ;;  %v1172_v29 = vmax.f32 %v1096_v27, 0.0  ;;  %v1117_v30 = vadd.f32 %v1541_v28, %v1993_v32 }
 0x35e   :  { %v1108_v31 = vpop.f32.mrf.mxu1 }
 0x35f   :  { %1204 = vst [vmem:[#allocation2 + $0x88] sm:$0xff] %v1172_v29  ;;  %v1177_v33 = vmax.f32 %v1117_v30, 0.0  ;;  %v1109_v34 = vadd.f32 %v1993_v32, %v1108_v31 }
 0x360   :  { %v1542_v35 = vpop.f32.mrf.mxu1 }
 0x361   :  { %1209 = vst [vmem:[#allocation2 + $0xb0] sm:$0xff] %v1177_v33  ;;  %v1175_v36 = vmax.f32 %v1109_v34, 0.0  ;;  %v1120_v47 = vadd.f32 %v1542_v35, %v1993_v32 }
 0x362   :  { %v1111_v37 = vpop.f32.mrf.mxu1 }
 0x363   :  { %1207 = vst [vmem:[#allocation2 + $0xa0] sm:$0xff] %v1175_v36  ;;  %v1178_v38 = vmax.f32 %v1120_v47, 0.0  ;;  %v1112_v39 = vadd.f32 %v1993_v32, %v1111_v37 }
 0x364   :  { %v1545_v40 = vpop.f32.mrf.mxu1 }
 0x365   :  { %1210 = vst [vmem:[#allocation2 + $0xb8] sm:$0xff] %v1178_v38  ;;  %v1176_v41 = vmax.f32 %v1112_v39, 0.0  ;;  %v1133_v42 = vadd.f32 %v1545_v40, %v1993_v32 }
 0x366   :  { %v1124_v43 = vpop.f32.mrf.mxu1 }
 0x367   :  { %1208 = vst [vmem:[#allocation2 + $0xa8] sm:$0xff] %v1176_v41  ;;  %v1181_v44 = vmax.f32 %v1133_v42, 0.0  ;;  %v1125_v59 = vadd.f32 %v1993_v32, %v1124_v43 }
 0x368   :  { %v1546_v45 = vpop.f32.mrf.mxu1 }
 0x369   :  { %1213 = vst [vmem:[#allocation2 + $0xd0] sm:$0xff] %v1181_v44  ;;  %v1179_v46 = vmax.f32 %v1125_v59, 0.0  ;;  %v1136_v48 = vadd.f32 %v1546_v45, %v1993_v32 }
 0x36a   :  { %v1127_v49 = vpop.f32.mrf.mxu1 }
 0x36b   :  { %1211 = vst [vmem:[#allocation2 + $0xc0] sm:$0xff] %v1179_v46  ;;  %v1182_v50 = vmax.f32 %v1136_v48, 0.0  ;;  %v1128_v51 = vadd.f32 %v1993_v32, %v1127_v49 }
 0x36c   :  { %v1549_v52 = vpop.f32.mrf.mxu1 }
 0x36d   :  { %1214 = vst [vmem:[#allocation2 + $0xd8] sm:$0xff] %v1182_v50  ;;  %v1180_v3 = vmax.f32 %v1128_v51, 0.0  ;;  %v1149_v53 = vadd.f32 %v1549_v52, %v1993_v32 }
 0x36e   :  { %v1140_v54 = vpop.f32.mrf.mxu1 }
 0x36f   :  { %1212 = vst [vmem:[#allocation2 + $0xc8] sm:$0xff] %v1180_v3  ;;  %v1185_v55 = vmax.f32 %v1149_v53, 0.0  ;;  %v1141_v57 = vadd.f32 %v1993_v32, %v1140_v54 }
 0x370   :  { %v1550_v58 = vpop.f32.mrf.mxu1 }
 0x371   :  { %1217 = vst [vmem:[#allocation2 + $0xf0] sm:$0xff] %v1185_v55  ;;  %v1183_v60 = vmax.f32 %v1141_v57, 0.0  ;;  %v1152_v61 = vadd.f32 %v1550_v58, %v1993_v32 }
 0x372   :  { %v1143_v62 = vpop.f32.mrf.mxu1 }
 0x373   :  { %1215 = vst [vmem:[#allocation2 + $0xe0] sm:$0xff] %v1183_v60  ;;  %v1186_v63 = vmax.f32 %v1152_v61, 0.0  ;;  %v1144_v0 = vadd.f32 %v1993_v32, %v1143_v62 }
 0x375   :  { %1218 = vst [vmem:[#allocation2 + $0xf8] sm:$0xff] %v1186_v63  ;;  %v1184_v1 = vmax.f32 %v1144_v0, 0.0 }
 0x377   :  { %1216 = vst [vmem:[#allocation2 + $0xe8] sm:$0xff] %v1184_v1 }
 0x378   :  { %1607 = shalt.err (!%p1604_p4)
}
 0x379   :  { %s1619_s16 = smov 128   ;;  %s1620_s17 = smov 8  }
 0x37a   :  { %1230 = dma.vmem_to_hbm [thread:$0]  %s1225_s14, 4096, %s2039_s9, [#allocation3], %s1619_s16, %s1619_s16, %s1620_s17  }
 0x37b   :  { %1616 = dma.done.wait [#allocation3], 4096  }
 0x37c   :  { %1617 = vsyncadd [#allocation3], 4294963200 }
 0x37d   :  { %1234 = vsyncpa [#allocation3], 1 }

</bundles_post_ra>
